<compile_context>
chip_gen: v6e
topology: v6e:2x2x1
jax: 0.10.0
libtpu: 0.0.40
codegen_flags: <defaults>
</compile_context>

<pallas_src>
import functools

import jax
import jax.numpy as jnp
from jax.experimental import pallas as pl
from jax.experimental.pallas import tpu as pltpu


def _nemoto_kernel(x_ref, o_ref, max_acc, sum_acc, first_acc, *, seq_len, s_tile):
    s = pl.program_id(1)
    n_s = pl.num_programs(1)

    # Native-dtype DMA; upcast to f32 here (VPU convert; required on v5e).
    x = x_ref[...].astype(jnp.float32)                    # (s_tile, c_tile)

    if seq_len % s_tile != 0:
        # Ragged last seq block: mask out-of-range rows (-inf for max, 0 for sum).
        row = jax.lax.broadcasted_iota(jnp.int32, (s_tile, 1), 0) + s * s_tile
        valid = row < seq_len
        x_max = jnp.where(valid, x, -jnp.inf)
        x_sum = jnp.where(valid, x, 0.0)
    else:
        x_max = x
        x_sum = x

    blk_max = jnp.max(x_max, axis=0, keepdims=True)       # (1, c_tile)
    blk_sum = jnp.sum(x_sum, axis=0, keepdims=True)       # (1, c_tile)

    @pl.when(s == 0)
    def _():
        max_acc[...] = blk_max
        sum_acc[...] = blk_sum
        first_acc[...] = x[0:1, :]                        # global row 0 lives in block s==0

    @pl.when(s != 0)
    def _():
        max_acc[...] = jnp.maximum(max_acc[...], blk_max)
        sum_acc[...] = sum_acc[...] + blk_sum

    @pl.when(s == n_s - 1)
    def _():
        mean = sum_acc[...] * jnp.float32(1.0 / seq_len)
        # Single dense store of the whole (3, c_tile) output block.
        o_ref[...] = jnp.concatenate(
            [max_acc[...], mean, first_acc[...]], axis=0).astype(o_ref.dtype)


def nemoto_pool(x, *, block_budget_bytes=2 * 1024 * 1024, max_c_tile=4096):
    """x: (seq, batch, hidden) -> (batch, 3*hidden), same dtype as x."""
    assert x.ndim == 3, "NemotoPooler expects a (seq, batch, hidden) input"
    S, B, H = x.shape
    C = B * H

    # Lane-dense 2-D view: (S, B*H). Free reshape (contiguous).
    x2d = x.reshape(S, C)

    # Column tiling: full width if it fits the budget nicely, else 128-lane-aligned
    # blocks (ragged last block is safe: per-column reductions, OOB discarded).
    if C <= max_c_tile:
        c_tile = C
    else:
        c_tile = max_c_tile  # multiple of 128

    # Sequence tile sized so the native-dtype input block stays ~2 MiB; rounded to a
    # multiple of 8 sublanes (or the full seq length).
    itemsize = jnp.dtype(x.dtype).itemsize
    bytes_per_seq_row = c_tile * itemsize
    raw = max(1, block_budget_bytes // max(bytes_per_seq_row, 1))
    if raw >= S:
        s_tile = S
    else:
        s_tile = max(8, (raw // 8) * 8)
        if s_tile >= S:
            s_tile = S

    grid = (pl.cdiv(C, c_tile), pl.cdiv(S, s_tile))

    kernel = functools.partial(_nemoto_kernel, seq_len=S, s_tile=s_tile)

    out2d = pl.pallas_call(
        kernel,
        out_shape=jax.ShapeDtypeStruct((3, C), x.dtype),
        grid_spec=pltpu.PrefetchScalarGridSpec(
            num_scalar_prefetch=0,
            grid=grid,
            in_specs=[
                # Native dtype, (seq_tile, col_tile) blocks.
                pl.BlockSpec((s_tile, c_tile), lambda c, s: (s, c)),
            ],
            out_specs=pl.BlockSpec((3, c_tile), lambda c, s: (0, c)),
            scratch_shapes=[
                pltpu.VMEM((1, c_tile), jnp.float32),   # running max
                pltpu.VMEM((1, c_tile), jnp.float32),   # running sum
                pltpu.VMEM((1, c_tile), jnp.float32),   # first row
            ],
        ),
        compiler_params=pltpu.CompilerParams(
            dimension_semantics=("parallel", "arbitrary")),
    )(x2d)

    # (3, B*H) -> (B, 3H): rows are [max, mean, first]; interleave per batch row.
    out = jnp.transpose(out2d.reshape(3, B, H), (1, 0, 2)).reshape(B, 3 * H)
    return out


def _reference(x):
    """Pure-JAX transcription of NemotoPooler.forward."""
    return jnp.concatenate([jnp.max(x, axis=0), jnp.mean(x, axis=0), x[0]], axis=-1)


if __name__ == "__main__":
    key = jax.random.PRNGKey(0)

    # Main small-shape case (single block in both grid axes).
    seq, batch, hidden = 8, 2, 32
    x = jax.random.normal(key, (seq, batch, hidden), dtype=jnp.float32)
    out = nemoto_pool(x)
    jax.block_until_ready(out)
    ref = _reference(x)
    assert out.shape == (batch, 3 * hidden), out.shape
    assert jnp.allclose(out, ref, atol=1e-5, rtol=1e-5), float(jnp.max(jnp.abs(out - ref)))

    # Exercise the tiled-reduction + ragged-seq-masking path with a tight budget.
    seq2, batch2, hidden2 = 300, 4, 160
    x2 = jax.random.normal(jax.random.PRNGKey(1), (seq2, batch2, hidden2), dtype=jnp.float32)
    out2 = nemoto_pool(x2, block_budget_bytes=160 * 1024)   # forces s_tile=64, ragged tail
    jax.block_until_ready(out2)
    ref2 = _reference(x2)
    assert out2.shape == (batch2, 3 * hidden2), out2.shape
    assert jnp.allclose(out2, ref2, atol=1e-4, rtol=1e-4), float(jnp.max(jnp.abs(out2 - ref2)))

    print("KERNEL_OK")
</pallas_src>

<mosaic_0001>
module attributes {stable_mosaic.version = 11 : i64} {
  func.func @_nemoto_kernel(%arg0: i32, %arg1: i32, %arg2: memref<8x64xf32, #tpu.memory_space<vmem>>, %arg3: memref<3x64xf32, #tpu.memory_space<vmem>>, %arg4: memref<1x64xf32, #tpu.memory_space<vmem>>, %arg5: memref<1x64xf32, #tpu.memory_space<vmem>>, %arg6: memref<1x64xf32, #tpu.memory_space<vmem>>) attributes {dimension_semantics = [#tpu.dimension_semantics<parallel>, #tpu.dimension_semantics<arbitrary>], iteration_bounds = array<i64: 1, 1>, scalar_prefetch = 0 : i64, scratch_operands = 3 : i64, tpu.core_type = #tpu.core_type<tc>, window_params = [{transform_indices = @transform_0, window_bounds = array<i64: 8, 64>}, {transform_indices = @transform_1, window_bounds = array<i64: 3, 64>}]} {
    %c0 = arith.constant 0 : index
    %c0_0 = arith.constant 0 : index
    %0 = vector.load %arg2[%c0, %c0_0] : memref<8x64xf32, #tpu.memory_space<vmem>>, vector<8x64xf32>
    %cst = arith.constant dense<0xFF800000> : vector<64xf32>
    %1 = vector.multi_reduction <maximumf>, %0, %cst [0] : vector<8x64xf32> to vector<64xf32>
    %2 = vector.shape_cast %1 : vector<64xf32> to vector<1x64xf32>
    %cst_1 = arith.constant dense<0.000000e+00> : vector<64xf32>
    %3 = vector.multi_reduction <add>, %0, %cst_1 [0] : vector<8x64xf32> to vector<64xf32>
    %4 = vector.shape_cast %3 : vector<64xf32> to vector<1x64xf32>
    %c0_i32 = arith.constant 0 : i32
    %5 = arith.cmpi eq, %arg1, %c0_i32 : i32
    %6 = arith.extui %5 : i1 to i32
    %c0_i32_2 = arith.constant 0 : i32
    %7 = arith.cmpi ne, %6, %c0_i32_2 : i32
    scf.if %7 {
      %c0_7 = arith.constant 0 : index
      %c0_8 = arith.constant 0 : index
      %14 = vector.load %arg4[%c0_7, %c0_8] : memref<1x64xf32, #tpu.memory_space<vmem>>, vector<1x64xf32>
      tpu.vector_store %arg4[%c0_7, %c0_8], %2 {strides = array<i32>} : memref<1x64xf32, #tpu.memory_space<vmem>>, vector<1x64xf32>,
      %c0_9 = arith.constant 0 : index
      %c0_10 = arith.constant 0 : index
      %15 = vector.load %arg5[%c0_9, %c0_10] : memref<1x64xf32, #tpu.memory_space<vmem>>, vector<1x64xf32>
      tpu.vector_store %arg5[%c0_9, %c0_10], %4 {strides = array<i32>} : memref<1x64xf32, #tpu.memory_space<vmem>>, vector<1x64xf32>,
      %16 = vector.extract_strided_slice %0 {offsets = [0, 0], sizes = [1, 64], strides = [1, 1]} : vector<8x64xf32> to vector<1x64xf32>
      %c0_11 = arith.constant 0 : index
      %c0_12 = arith.constant 0 : index
      %17 = vector.load %arg6[%c0_11, %c0_12] : memref<1x64xf32, #tpu.memory_space<vmem>>, vector<1x64xf32>
      tpu.vector_store %arg6[%c0_11, %c0_12], %16 {strides = array<i32>} : memref<1x64xf32, #tpu.memory_space<vmem>>, vector<1x64xf32>,
    } else {
    }
    %c0_i32_3 = arith.constant 0 : i32
    %8 = arith.cmpi ne, %arg1, %c0_i32_3 : i32
    %9 = arith.extui %8 : i1 to i32
    %c0_i32_4 = arith.constant 0 : i32
    %10 = arith.cmpi ne, %9, %c0_i32_4 : i32
    scf.if %10 {
      %c0_7 = arith.constant 0 : index
      %c0_8 = arith.constant 0 : index
      %14 = vector.load %arg4[%c0_7, %c0_8] : memref<1x64xf32, #tpu.memory_space<vmem>>, vector<1x64xf32>
      %15 = arith.maximumf %14, %2 : vector<1x64xf32>
      %c0_9 = arith.constant 0 : index
      %c0_10 = arith.constant 0 : index
      %16 = vector.load %arg4[%c0_9, %c0_10] : memref<1x64xf32, #tpu.memory_space<vmem>>, vector<1x64xf32>
      tpu.vector_store %arg4[%c0_9, %c0_10], %15 {strides = array<i32>} : memref<1x64xf32, #tpu.memory_space<vmem>>, vector<1x64xf32>,
      %c0_11 = arith.constant 0 : index
      %c0_12 = arith.constant 0 : index
      %17 = vector.load %arg5[%c0_11, %c0_12] : memref<1x64xf32, #tpu.memory_space<vmem>>, vector<1x64xf32>
      %18 = arith.addf %17, %4 : vector<1x64xf32>
      %c0_13 = arith.constant 0 : index
      %c0_14 = arith.constant 0 : index
      %19 = vector.load %arg5[%c0_13, %c0_14] : memref<1x64xf32, #tpu.memory_space<vmem>>, vector<1x64xf32>
      tpu.vector_store %arg5[%c0_13, %c0_14], %18 {strides = array<i32>} : memref<1x64xf32, #tpu.memory_space<vmem>>, vector<1x64xf32>,
    } else {
    }
    %c0_i32_5 = arith.constant 0 : i32
    %11 = arith.cmpi eq, %arg1, %c0_i32_5 : i32
    %12 = arith.extui %11 : i1 to i32
    %c0_i32_6 = arith.constant 0 : i32
    %13 = arith.cmpi ne, %12, %c0_i32_6 : i32
    scf.if %13 {
      %c0_7 = arith.constant 0 : index
      %c0_8 = arith.constant 0 : index
      %14 = vector.load %arg5[%c0_7, %c0_8] : memref<1x64xf32, #tpu.memory_space<vmem>>, vector<1x64xf32>
      %cst_9 = arith.constant 1.250000e-01 : f32
      %15 = vector.broadcast %cst_9 : f32 to vector<1x64xf32>
      %16 = arith.mulf %14, %15 : vector<1x64xf32>
      %c0_10 = arith.constant 0 : index
      %c0_11 = arith.constant 0 : index
      %17 = vector.load %arg4[%c0_10, %c0_11] : memref<1x64xf32, #tpu.memory_space<vmem>>, vector<1x64xf32>
      %c0_12 = arith.constant 0 : index
      %c0_13 = arith.constant 0 : index
      %18 = vector.load %arg6[%c0_12, %c0_13] : memref<1x64xf32, #tpu.memory_space<vmem>>, vector<1x64xf32>
      %19 = tpu.concatenate %17, %16, %18 in 0 : vector<1x64xf32>, vector<1x64xf32>, vector<1x64xf32> -> vector<3x64xf32>
      %c0_14 = arith.constant 0 : index
      %c0_15 = arith.constant 0 : index
      %20 = vector.load %arg3[%c0_14, %c0_15] : memref<3x64xf32, #tpu.memory_space<vmem>>, vector<3x64xf32>
      tpu.vector_store %arg3[%c0_14, %c0_15], %19 {strides = array<i32>} : memref<3x64xf32, #tpu.memory_space<vmem>>, vector<3x64xf32>,
    } else {
    }
    return
  }
  func.func @transform_0(%arg0: i32, %arg1: i32) -> (i32, i32) {
    %c0_i32 = arith.constant 0 : i32
    return %arg1, %arg0 : i32, i32
  }
  func.func @transform_1(%arg0: i32, %arg1: i32) -> (i32, i32) {
    %c0_i32 = arith.constant 0 : i32
    %c0_i32_0 = arith.constant 0 : i32
    return %c0_i32, %arg0 : i32, i32
  }
}

</mosaic_0001>

<bundles_post_ra>
// kernel: tpu_custom_call.1
= control target key start
LH: loop header
LB: loop body
LE: loop exit
PB: predicated region body
PF: predicated region fallthrough
CT: control target
= control target key end

     0   :  { %6 = vsyncpa [#allocation6], 0  ;;  %s164_s0 = inlined_call_operand.hbm [shape: f32[8,64], index: 0, kind: input, shape index: {}]   ;;  %s165_s1 = inlined_call_operand.hbm [shape: f32[3,64], index: 1, kind: output, shape index: {}]  }
   0x1   :  { %7 = vsyncpa [#allocation7], 0  ;;  %s143_s6 = smov [#allocation5]  }
   0x2   :  { %s14_s7 = sshll.u32 %s143_s6, 4  ;;  %s15_s7 = int_to_ptr.vmem [resolvable:$true] %s14_s7 }
   0x3   :  { %s107_s8 = scalar_lea.vmem %s15_s7, 128  ;;  %p112_p1 = scmp.lt.s32.totalorder %s15_s7, %s15_s7 }
   0x4   :  { %p108_p0 = scmp.ne.s32.totalorder %s15_s7, %s107_s8  ;;  %p113_p2 = scmp.lt.s32.totalorder %s107_s8, %s107_s8 }
   0x6   :  { %p114_p3 = por %p113_p2, %p112_p1 }
   0x8   :  { %p115_p4 = pnand %p114_p3, %p108_p0 }
   0xa   :  { %118 = shalt.err (!%p115_p4)
}
   0xb   :  { %17 = dma.hbm_to_vmem [thread:$0]  %s164_s0, 128, %s15_s7, [#allocation6]  }
   0xc   :  { %139 = dma.done.wait [#allocation6], 128  }
   0xd   :  { %140 = vsyncadd [#allocation6], 4294967168  ;;  %vm22_vm0 = vcmask 523264   ;;  %v21_v0 = vld [vmem:[#allocation5] sm:$0xff]  ;;  %vm41_vm1 = vcmask 516096   ;;  %v64_v15 = vlaneseq  ;;  %vm75_vm2 = vcmask 1040384  }
   0xe   :  { %v30_v1 = vsel %vm22_vm0, %v21_v0, 0.0  ;;  %44 = vst.msk [vmem:[#allocation4] sm:$0x1] %vm41_vm1, %v21_v0  ;;  %v23_v2 = vsel %vm22_vm0, %v21_v0, -inf  ;;  %s144_s0 = smov [#allocation8]   ;;  %vm77_vm3 = vcmask 1041408  }
   0xf   :  { %v31_v3 = vrot.slane %v30_v1, 4  ;;  %v24_v4 = vrot.slane %v23_v2, 4  ;;  %v65_v16 = vshrl.u32 %v64_v15, 7  ;;  %s87_s11 = sshll.u32 %s144_s0, 4  ;;  %vm79_vm4 = vcmask 518144   ;;  %s88_s11 = int_to_ptr.vmem [resolvable:$true] %s87_s11 }
  0x10   :  { %s119_s12 = scalar_lea.vmem %s88_s11, 64  ;;  %p124_p6 = scmp.lt.s32.totalorder %s88_s11, %s88_s11 }
  0x11   :  { %v32_v5 = vadd.f32 %v31_v3, %v30_v1  ;;  %v25_v6 = vmax.f32 %v23_v2, %v24_v4  ;;  %v66_v17 = vsub.s32 0, %v65_v16  ;;  %p120_p5 = scmp.ne.s32.totalorder %s88_s11, %s119_s12  ;;  %p125_p7 = scmp.lt.s32.totalorder %s119_s12, %s119_s12 }
  0x13   :  { %v33_v7 = vrot.slane %v32_v5, 2  ;;  %v26_v8 = vrot.slane %v25_v6, 2  ;;  %p126_p8 = por %p125_p7, %p124_p6 }
  0x15   :  { %v34_v9 = vadd.f32 %v33_v7, %v32_v5  ;;  %v27_v10 = vmax.f32 %v25_v6, %v26_v8  ;;  %v96_v21 = vld [vmem:[#allocation4] ss:$0 sm:$0xff]  ;;  %p127_p9 = pnand %p126_p8, %p120_p5 }
  0x17   :  { %v35_v11 = vrot.slane %v34_v9, 1  ;;  %v28_v12 = vrot.slane %v27_v10, 1 }
  0x19   :  { %v36_v13 = vadd.f32 %v35_v11, %v34_v9  ;;  %v29_v14 = vmax.f32 %v27_v10, %v28_v12 }
  0x1b   :  { %43 = vst.msk [vmem:[#allocation3] sm:$0x1] %vm41_vm1, %v36_v13  ;;  %42 = vst.msk [vmem:[#allocation2] sm:$0x1] %vm41_vm1, %v29_v14 }
  0x22   :  { %v59_v18 = vld [vmem:[#allocation3] sm:$0x1]  ;;  %v61_v20 = vld [vmem:[#allocation2] sm:$0x1] }
  0x23   :  { %v60_v19 = vmul.f32 0.125, %v59_v18 }
  0x25   :  { %v67_v22 = vrot.slane %v60_v19, %v66_v17 }
  0x27   :  { %v76_v23 = vsel %vm75_vm2, %v61_v20, %v67_v22 }
  0x28   :  { %v78_v24 = vsel %vm77_vm3, %v76_v23, %v96_v21 }
  0x29   :  { %80 = vst.msk [vmem:[#allocation8] sm:$0x7] %vm79_vm4, %v78_v24 }
  0x2a   :  { %130 = shalt.err (!%p127_p9)
}
  0x2b   :  { %90 = dma.vmem_to_hbm [thread:$0]  %s88_s11, 64, %s165_s1, [#allocation7]  }
  0x2c   :  { %141 = dma.done.wait [#allocation7], 64  }
  0x2d   :  { %142 = vsyncadd [#allocation7], 4294967232 }
  0x2e   :  { %94 = vsyncpa [#allocation6], 1 }
  0x2f   :  { %95 = vsyncpa [#allocation7], 1 }

</bundles_post_ra>
